<compile_context>
chip_gen: v7x
topology: tpu7x:2x2x1
jax: 0.10.0
libtpu: 0.0.40
codegen_flags: <defaults>
</compile_context>

<pallas_src>
import functools

import jax
import jax.numpy as jnp
from jax.experimental import pallas as pl
from jax.experimental.pallas import tpu as pltpu


def _round_up(n: int, m: int) -> int:
    return ((n + m - 1) // m) * m


def _ffn_kernel(x_ref, w1_ref, b1_ref, w2_ref, b2_ref, o_ref):
    """relu(x @ W1 + b1) @ W2 + b2 (eval mode / no dropout)."""
    h = jnp.dot(x_ref[...], w1_ref[...], preferred_element_type=jnp.float32)
    h = jnp.maximum(h + b1_ref[...], 0.0)
    h = h.astype(w2_ref.dtype)                      # native dtype into 2nd MXU pass
    y = jnp.dot(h, w2_ref[...], preferred_element_type=jnp.float32) + b2_ref[...]
    o_ref[...] = y.astype(o_ref.dtype)


def _ffn_dropout_kernel(x_ref, w1_ref, b1_ref, w2_ref, b2_ref, mask_ref, o_ref):
    """relu(x @ W1 + b1) * mask @ W2 + b2 (training mode; mask pre-scaled)."""
    h = jnp.dot(x_ref[...], w1_ref[...], preferred_element_type=jnp.float32)
    h = jnp.maximum(h + b1_ref[...], 0.0)
    h = h * mask_ref[...]                           # mask already holds 0 or 1/keep_prob
    h = h.astype(w2_ref.dtype)
    y = jnp.dot(h, w2_ref[...], preferred_element_type=jnp.float32) + b2_ref[...]
    o_ref[...] = y.astype(o_ref.dtype)


def feed_forward(x, w1, b1, w2, b2, *, dropout_p=0.1, training=False,
                 rng_key=None, tile_m=256):
    """Position-wise FFN.

    x:       [B, S, D]
    w1, w2:  PyTorch-layout Linear weights [D_out, D_in] (here D x D)
    b1, b2:  [D]
    """
    B, S, D = x.shape
    M = B * S
    dtype = x.dtype

    # ---- tiling / padding ----------------------------------------------------
    D_pad = _round_up(D, 128)                       # lane-dense last dim
    sub = 32 // jnp.dtype(dtype).itemsize           # sublane tile: 8 f32 / 16 bf16
    tile_m = _round_up(min(tile_m, _round_up(M, sub)), sub)
    M_pad = _round_up(M, tile_m)
    grid_m = M_pad // tile_m

    x2d = jnp.pad(x.reshape(M, D), ((0, M_pad - M), (0, D_pad - D)))

    # Pre-transpose weights to [D_in, D_out] so the kernel computes x @ W.
    # (For a real model, do this once outside the hot path.)
    w1_t = jnp.pad(jnp.transpose(w1).astype(dtype),
                   ((0, D_pad - D), (0, D_pad - D)))
    w2_t = jnp.pad(jnp.transpose(w2).astype(dtype),
                   ((0, D_pad - D), (0, D_pad - D)))
    b1_2d = jnp.pad(b1.astype(jnp.float32), (0, D_pad - D)).reshape(1, D_pad)
    b2_2d = jnp.pad(b2.astype(jnp.float32), (0, D_pad - D)).reshape(1, D_pad)

    use_dropout = training and dropout_p > 0.0
    operands = [x2d, w1_t, b1_2d, w2_t, b2_2d]
    in_specs = [
        pl.BlockSpec((tile_m, D_pad), lambda i: (i, 0)),   # x rows
        pl.BlockSpec((D_pad, D_pad), lambda i: (0, 0)),    # W1^T (resident)
        pl.BlockSpec((1, D_pad),     lambda i: (0, 0)),    # b1
        pl.BlockSpec((D_pad, D_pad), lambda i: (0, 0)),    # W2^T (resident)
        pl.BlockSpec((1, D_pad),     lambda i: (0, 0)),    # b2
    ]

    if use_dropout:
        if rng_key is None:
            rng_key = jax.random.PRNGKey(0)
        keep_prob = 1.0 - float(dropout_p)
        keep = jax.random.bernoulli(rng_key, keep_prob, (M_pad, D_pad))
        # Pre-scaled mask: multiply instead of divide inside the kernel.
        mask = keep.astype(jnp.float32) * jnp.float32(1.0 / keep_prob)
        operands.append(mask)
        in_specs.append(pl.BlockSpec((tile_m, D_pad), lambda i: (i, 0)))
        kernel = _ffn_dropout_kernel
    else:
        kernel = _ffn_kernel

    itemsize = jnp.dtype(dtype).itemsize
    bytes_accessed = (M_pad * D_pad * itemsize            # x
                      + 2 * D_pad * D_pad * itemsize      # W1, W2
                      + 2 * D_pad * 4                     # biases
                      + M_pad * D_pad * itemsize          # out
                      + (M_pad * D_pad * 4 if use_dropout else 0))
    cost = pl.CostEstimate(flops=4 * M_pad * D_pad * D_pad,
                           transcendentals=0,
                           bytes_accessed=bytes_accessed)

    out2d = pl.pallas_call(
        kernel,
        out_shape=jax.ShapeDtypeStruct((M_pad, D_pad), dtype),
        grid_spec=pltpu.PrefetchScalarGridSpec(
            num_scalar_prefetch=0,
            grid=(grid_m,),
            in_specs=in_specs,
            out_specs=pl.BlockSpec((tile_m, D_pad), lambda i: (i, 0)),
        ),
        compiler_params=pltpu.CompilerParams(
            dimension_semantics=("parallel",),     # tiles independent -> v7x 2-TC
            vmem_limit_bytes=64 * 1024 * 1024,     # headroom for large tile_m
        ),
        cost_estimate=cost,
    )(*operands)

    return out2d[:M, :D].reshape(B, S, D)


def _ref_feed_forward(x, w1, b1, w2, b2):
    """Pure-JAX eval-mode reference (dropout = identity)."""
    h = jnp.maximum(jnp.einsum('bsd,ed->bse', x, w1) + b1, 0.0)
    return jnp.einsum('bsd,ed->bse', h, w2) + b2


if __name__ == "__main__":
    B, S, D = 2, 8, 32          # batch, seq, dmodel
    key = jax.random.PRNGKey(0)
    kx, k1, k2, k3, k4, kd = jax.random.split(key, 6)

    x = jax.random.normal(kx, (B, S, D), dtype=jnp.float32)
    # nn.Linear(dmodel, dmodel): weight [D, D], bias [D]
    bound = 1.0 / (D ** 0.5)
    w1 = jax.random.uniform(k1, (D, D), minval=-bound, maxval=bound)
    b1 = jax.random.uniform(k2, (D,),   minval=-bound, maxval=bound)
    w2 = jax.random.uniform(k3, (D, D), minval=-bound, maxval=bound)
    b2 = jax.random.uniform(k4, (D,),   minval=-bound, maxval=bound)

    # eval mode (dropout = identity) -> exact reference check
    out = jax.block_until_ready(
        feed_forward(x, w1, b1, w2, b2, dropout_p=0.1, training=False))
    ref = _ref_feed_forward(x, w1, b1, w2, b2)
    assert out.shape == (B, S, D)
    assert jnp.allclose(out, ref, atol=1e-4, rtol=1e-4), "mismatch vs reference"

    # dropout_p=0 in training mode must equal eval
    out_p0 = jax.block_until_ready(
        feed_forward(x, w1, b1, w2, b2, dropout_p=0.0, training=True))
    assert jnp.allclose(out_p0, ref, atol=1e-4, rtol=1e-4), "p=0 training mismatch"

    # training-mode dropout path (stochastic; check shape / finiteness only)
    out_train = jax.block_until_ready(
        feed_forward(x, w1, b1, w2, b2, dropout_p=0.1, training=True, rng_key=kd))
    assert out_train.shape == (B, S, D)
    assert bool(jnp.all(jnp.isfinite(out_train)))

    print("KERNEL_OK")
</pallas_src>

<mosaic_0001>
module attributes {stable_mosaic.version = 11 : i64} {
  func.func @_ffn_kernel(%arg0: i32, %arg1: memref<16x128xf32, #tpu.memory_space<vmem>>, %arg2: memref<128x128xf32, #tpu.memory_space<vmem>>, %arg3: memref<1x128xf32, #tpu.memory_space<vmem>>, %arg4: memref<128x128xf32, #tpu.memory_space<vmem>>, %arg5: memref<1x128xf32, #tpu.memory_space<vmem>>, %arg6: memref<16x128xf32, #tpu.memory_space<vmem>>) attributes {dimension_semantics = [#tpu.dimension_semantics<parallel>], iteration_bounds = array<i64: 1>, scalar_prefetch = 0 : i64, scratch_operands = 0 : i64, tpu.core_type = #tpu.core_type<tc>, window_params = [{transform_indices = @transform_0, window_bounds = array<i64: 16, 128>}, {pipeline_mode = #tpu.pipeline_mode<synchronous>, transform_indices = @transform_1, window_bounds = array<i64: 128, 128>}, {pipeline_mode = #tpu.pipeline_mode<synchronous>, transform_indices = @transform_2, window_bounds = array<i64: 1, 128>}, {pipeline_mode = #tpu.pipeline_mode<synchronous>, transform_indices = @transform_3, window_bounds = array<i64: 128, 128>}, {pipeline_mode = #tpu.pipeline_mode<synchronous>, transform_indices = @transform_4, window_bounds = array<i64: 1, 128>}, {transform_indices = @transform_5, window_bounds = array<i64: 16, 128>}]} {
    %c0 = arith.constant 0 : index
    %c0_0 = arith.constant 0 : index
    %0 = vector.load %arg1[%c0, %c0_0] : memref<16x128xf32, #tpu.memory_space<vmem>>, vector<16x128xf32>
    %c0_1 = arith.constant 0 : index
    %c0_2 = arith.constant 0 : index
    %1 = vector.load %arg2[%c0_1, %c0_2] : memref<128x128xf32, #tpu.memory_space<vmem>>, vector<128x128xf32>
    %cst = arith.constant dense<0.000000e+00> : vector<16x128xf32>
    %2 = tpu.matmul %0, %1, %cst {dimension_numbers = #tpu.dot_dimension_numbers<[1], [0], [0], [1], [0, 0, 1, 1], [], []>} : vector<16x128xf32>, vector<128x128xf32>, vector<16x128xf32> -> vector<16x128xf32>
    %c0_3 = arith.constant 0 : index
    %c0_4 = arith.constant 0 : index
    %3 = vector.load %arg3[%c0_3, %c0_4] : memref<1x128xf32, #tpu.memory_space<vmem>>, vector<1x128xf32>
    %4 = vector.broadcast %3 : vector<1x128xf32> to vector<16x128xf32>
    %5 = arith.addf %2, %4 : vector<16x128xf32>
    %cst_5 = arith.constant 0.000000e+00 : f32
    %6 = vector.broadcast %cst_5 : f32 to vector<16x128xf32>
    %7 = arith.maximumf %5, %6 : vector<16x128xf32>
    %c0_6 = arith.constant 0 : index
    %c0_7 = arith.constant 0 : index
    %8 = vector.load %arg4[%c0_6, %c0_7] : memref<128x128xf32, #tpu.memory_space<vmem>>, vector<128x128xf32>
    %cst_8 = arith.constant dense<0.000000e+00> : vector<16x128xf32>
    %9 = tpu.matmul %7, %8, %cst_8 {dimension_numbers = #tpu.dot_dimension_numbers<[1], [0], [0], [1], [0, 0, 1, 1], [], []>} : vector<16x128xf32>, vector<128x128xf32>, vector<16x128xf32> -> vector<16x128xf32>
    %c0_9 = arith.constant 0 : index
    %c0_10 = arith.constant 0 : index
    %10 = vector.load %arg5[%c0_9, %c0_10] : memref<1x128xf32, #tpu.memory_space<vmem>>, vector<1x128xf32>
    %11 = vector.broadcast %10 : vector<1x128xf32> to vector<16x128xf32>
    %12 = arith.addf %9, %11 : vector<16x128xf32>
    %c0_11 = arith.constant 0 : index
    %c0_12 = arith.constant 0 : index
    %13 = vector.load %arg6[%c0_11, %c0_12] : memref<16x128xf32, #tpu.memory_space<vmem>>, vector<16x128xf32>
    tpu.vector_store %arg6[%c0_11, %c0_12], %12 {strides = array<i32>} : memref<16x128xf32, #tpu.memory_space<vmem>>, vector<16x128xf32>,
    return
  }
  func.func @transform_0(%arg0: i32) -> (i32, i32) {
    %c0_i32 = arith.constant 0 : i32
    %c0_i32_0 = arith.constant 0 : i32
    return %arg0, %c0_i32 : i32, i32
  }
  func.func @transform_1(%arg0: i32) -> (i32, i32) {
    %c0_i32 = arith.constant 0 : i32
    %c0_i32_0 = arith.constant 0 : i32
    %c0_i32_1 = arith.constant 0 : i32
    return %c0_i32, %c0_i32_0 : i32, i32
  }
  func.func @transform_2(%arg0: i32) -> (i32, i32) {
    %c0_i32 = arith.constant 0 : i32
    %c0_i32_0 = arith.constant 0 : i32
    %c0_i32_1 = arith.constant 0 : i32
    return %c0_i32, %c0_i32_0 : i32, i32
  }
  func.func @transform_3(%arg0: i32) -> (i32, i32) {
    %c0_i32 = arith.constant 0 : i32
    %c0_i32_0 = arith.constant 0 : i32
    %c0_i32_1 = arith.constant 0 : i32
    return %c0_i32, %c0_i32_0 : i32, i32
  }
  func.func @transform_4(%arg0: i32) -> (i32, i32) {
    %c0_i32 = arith.constant 0 : i32
    %c0_i32_0 = arith.constant 0 : i32
    %c0_i32_1 = arith.constant 0 : i32
    return %c0_i32, %c0_i32_0 : i32, i32
  }
  func.func @transform_5(%arg0: i32) -> (i32, i32) {
    %c0_i32 = arith.constant 0 : i32
    %c0_i32_0 = arith.constant 0 : i32
    return %arg0, %c0_i32 : i32, i32
  }
}

</mosaic_0001>

<bundles_post_ra>
// kernel: tpu_custom_call.1
= control target key start
LH: loop header
LB: loop body
LE: loop exit
PB: predicated region body
PF: predicated region fallthrough
CT: control target
= control target key end

     0   :  { %10 = vsyncpa [#allocation3], 0  ;;  %s755_s0 = inlined_call_operand.hbm [shape: f32[16,128], index: 0, kind: input, shape index: {}]   ;;  %s756_s1 = inlined_call_operand.hbm [shape: f32[128,128], index: 1, kind: input, shape index: {}]   ;;  %s757_s2 = inlined_call_operand.hbm [shape: f32[1,128], index: 2, kind: input, shape index: {}]   ;;  %s758_s3 = inlined_call_operand.hbm [shape: f32[128,128], index: 3, kind: input, shape index: {}]   ;;  %s759_s4 = inlined_call_operand.hbm [shape: f32[1,128], index: 4, kind: input, shape index: {}]   ;;  %s760_s5 = inlined_call_operand.hbm [shape: f32[16,128], index: 5, kind: output, shape index: {}]  }
   0x1   :  { %11 = vsyncpa [#allocation6], 0 }
   0x2   :  { %12 = vsyncpa [#allocation9], 0 }
   0x3   :  { %13 = vsyncpa [#allocation4], 0  ;;  %s626_s18 = smov [#allocation5]   ;;  %s627_s20 = smov [#allocation8]  }
   0x4   :  { %s31_s19 = sshll.u32 %s626_s18, 4  ;;  %s53_s21 = sshll.u32 %s627_s20, 4  ;;  %s32_s19 = int_to_ptr.vmem [resolvable:$true] %s31_s19  ;;  %s664_s21 = int_to_ptr.vmem [resolvable:$true] %s53_s21 }
   0x5   :  { %s486_s24 = scalar_lea.hbm %s756_s1, 2048 }
   0x6   :  { %p487_p0 = scmp.ne.s32.totalorder %s756_s1, %s486_s24  ;;  %p490_p1 = scmp.lt.u32.totalorder %s486_s24, %s756_s1 }
   0x8   :  { %p492_p2 = pnand %p490_p1, %p487_p0 }
   0xa   :  { %495 = shalt.err (!%p492_p2)
}
   0xb   :  { %s496_s29 = scalar_lea.vmem %s32_s19, 2048  ;;  %p501_p4 = scmp.lt.s32.totalorder %s32_s19, %s32_s19 }
   0xc   :  { %p497_p3 = scmp.ne.s32.totalorder %s32_s19, %s496_s29  ;;  %p502_p5 = scmp.lt.s32.totalorder %s496_s29, %s496_s29 }
   0xe   :  { %p503_p6 = por %p502_p5, %p501_p4 }
  0x10   :  { %p504_p7 = pnand %p503_p6, %p497_p3 }
  0x12   :  { %507 = shalt.err (!%p504_p7)
}
  0x13   :  { %s628_s30 = smov 128   ;;  %s629_s6 = smov 8  }
  0x14   :  { %37 = dma.hbm_to_vmem [thread:$0]  %s756_s1, 2048, %s32_s19, [#allocation6], %s628_s30, %s628_s30, %s629_s6  }
  0x15   :  { %s508_s11 = scalar_lea.hbm %s758_s3, 2048 }
  0x16   :  { %p509_p8 = scmp.ne.s32.totalorder %s758_s3, %s508_s11  ;;  %p512_p9 = scmp.lt.u32.totalorder %s508_s11, %s758_s3 }
  0x18   :  { %p514_p10 = pnand %p512_p9, %p509_p8 }
  0x1a   :  { %517 = shalt.err (!%p514_p10)
}
  0x1b   :  { %s518_s16 = scalar_lea.vmem %s664_s21, 2048  ;;  %p523_p12 = scmp.lt.s32.totalorder %s664_s21, %s664_s21 }
  0x1c   :  { %p519_p11 = scmp.ne.s32.totalorder %s664_s21, %s518_s16  ;;  %p524_p13 = scmp.lt.s32.totalorder %s518_s16, %s518_s16 }
  0x1e   :  { %p525_p0 = por %p524_p13, %p523_p12 }
  0x20   :  { %p526_p1 = pnand %p525_p0, %p519_p11 }
  0x22   :  { %529 = shalt.err (!%p526_p1)
}
  0x23   :  { %59 = dma.hbm_to_vmem [thread:$0]  %s758_s3, 2048, %s664_s21, [#allocation9], %s628_s30, %s628_s30, %s629_s6  }
  0x24   :  { %s630_s18 = smov [#allocation2]   ;;  %s631_s20 = smov [#allocation7]  }
  0x25   :  { %s19_s19 = sshll.u32 %s630_s18, 4  ;;  %s44_s22 = sshll.u32 %s631_s20, 4  ;;  %s20_s19 = int_to_ptr.vmem [resolvable:$true] %s19_s19  ;;  %s45_s22 = int_to_ptr.vmem [resolvable:$true] %s44_s22 }
  0x26   :  { %s530_s25 = scalar_lea.hbm %s755_s0, 256 }
  0x27   :  { %p531_p2 = scmp.ne.s32.totalorder %s755_s0, %s530_s25  ;;  %p534_p3 = scmp.lt.u32.totalorder %s530_s25, %s755_s0 }
  0x29   :  { %p536_p4 = pnand %p534_p3, %p531_p2 }
  0x2b   :  { %539 = shalt.err (!%p536_p4)
}
  0x2c   :  { %s540_s3 = scalar_lea.vmem %s20_s19, 256  ;;  %p545_p6 = scmp.lt.s32.totalorder %s20_s19, %s20_s19 }
  0x2d   :  { %p541_p5 = scmp.ne.s32.totalorder %s20_s19, %s540_s3  ;;  %p546_p7 = scmp.lt.s32.totalorder %s540_s3, %s540_s3 }
  0x2f   :  { %p547_p8 = por %p546_p7, %p545_p6 }
  0x31   :  { %p548_p9 = pnand %p547_p8, %p541_p5 }
  0x33   :  { %551 = shalt.err (!%p548_p9)
}
  0x34   :  { %25 = dma.hbm_to_vmem [thread:$0]  %s755_s0, 256, %s20_s19, [#allocation3], %s628_s30, %s628_s30, %s629_s6  }
  0x35   :  { %s552_s10 = scalar_lea.hbm %s757_s2, 16 }
  0x36   :  { %p553_p10 = scmp.ne.s32.totalorder %s757_s2, %s552_s10  ;;  %p556_p11 = scmp.lt.u32.totalorder %s552_s10, %s757_s2 }
  0x38   :  { %p558_p12 = pnand %p556_p11, %p553_p10 }
  0x3a   :  { %561 = shalt.err (!%p558_p12)
}
  0x3b   :  { %s562_s15 = scalar_lea.vmem %s45_s22, 16  ;;  %s566_s16 = scalar_lea.vmem %s45_s22, 32 }
  0x3c   :  { %p563_p13 = scmp.ne.s32.totalorder %s45_s22, %s562_s15  ;;  %p567_p0 = scmp.lt.s32.totalorder %s45_s22, %s45_s22 }
  0x3d   :  { %p568_p1 = scmp.lt.s32.totalorder %s566_s16, %s562_s15 }
  0x3f   :  { %p569_p2 = por %p568_p1, %p567_p0 }
  0x41   :  { %p570_p3 = pnand %p569_p2, %p563_p13 }
  0x43   :  { %573 = shalt.err (!%p570_p3)
}
  0x44   :  { %47 = dma.hbm_to_vmem [thread:$0]  %s757_s2, 16, %s45_s22, [#allocation6]  }
  0x45   :  { %s632_s17 = smov [#allocation10]   ;;  %s574_s23 = scalar_lea.hbm %s759_s4, 16 }
  0x46   :  { %s66_s18 = sshll.u32 %s632_s17, 4  ;;  %p575_p4 = scmp.ne.s32.totalorder %s759_s4, %s574_s23  ;;  %s67_s18 = int_to_ptr.vmem [resolvable:$true] %s66_s18 }
  0x47   :  { %p578_p5 = scmp.lt.u32.totalorder %s574_s23, %s759_s4 }
  0x49   :  { %p580_p6 = pnand %p578_p5, %p575_p4 }
  0x4b   :  { %583 = shalt.err (!%p580_p6)
}
  0x4c   :  { %s584_s28 = scalar_lea.vmem %s67_s18, 16  ;;  %s588_s2 = scalar_lea.vmem %s67_s18, 32 }
  0x4d   :  { %p585_p7 = scmp.ne.s32.totalorder %s67_s18, %s584_s28  ;;  %p589_p8 = scmp.lt.s32.totalorder %s67_s18, %s67_s18 }
  0x4e   :  { %p590_p9 = scmp.lt.s32.totalorder %s588_s2, %s584_s28 }
  0x50   :  { %p591_p10 = por %p590_p9, %p589_p8 }
  0x52   :  { %p592_p11 = pnand %p591_p10, %p585_p7 }
  0x54   :  { %595 = shalt.err (!%p592_p11)
}
  0x55   :  { %69 = dma.hbm_to_vmem [thread:$0]  %s759_s4, 16, %s67_s18, [#allocation9]  }
  0x56   :  { %618 = dma.done.wait [#allocation3], 256  }
  0x57   :  { %619 = vsyncadd [#allocation3], 4294967040 }
  0x58   :  { %620 = dma.done.wait [#allocation6], 2064  }
  0x59   :  { %621 = vsyncadd [#allocation6], 4294965232 }
  0x5a   :  { %622 = dma.done.wait [#allocation9], 2064  }
  0x5b   :  { %623 = vsyncadd [#allocation9], 4294965232  ;;  %v87_v0 = vld [vmem:[#allocation5] sm:$0xff]  ;;  %v88_v1 = vld [vmem:[#allocation5 + $0x8] sm:$0xff]  ;;  %s633_s4 = smov [#allocation11]  }
  0x5c   :  { %v89_v2 = vld [vmem:[#allocation5 + $0x10] sm:$0xff]  ;;  %v414_v3 = vpack.c.bf16 %v88_v1, %v87_v0  ;;  %v90_v4 = vld [vmem:[#allocation5 + $0x18] sm:$0xff]  ;;  %v91_v6 = vld [vmem:[#allocation5 + $0x20] sm:$0xff]  ;;  %s292_s3 = sshll.u32 %s633_s4, 4  ;;  %s293_s3 = int_to_ptr.vmem [resolvable:$true] %s292_s3 }
  0x5d   :  { %v418_v5 = vpack.c.bf16 %v90_v4, %v89_v2  ;;  %v92_v7 = vld [vmem:[#allocation5 + $0x28] sm:$0xff]  ;;  %v93_v9 = vld [vmem:[#allocation5 + $0x30] sm:$0xff]  ;;  %v94_v10 = vld [vmem:[#allocation5 + $0x38] sm:$0xff]  ;;  %s596_s21 = scalar_lea.vmem %s293_s3, 256  ;;  %p601_p13 = scmp.lt.s32.totalorder %s293_s3, %s293_s3 }
  0x5e   :  { %415 = vmatprep.subr.bf16.mxu0 %v414_v3  ;;  %v422_v8 = vpack.c.bf16 %v92_v7, %v91_v6  ;;  %v85_v11 = vld [vmem:[#allocation2] sm:$0xff]  ;;  %v187_v12 = vld [vmem:[#allocation8] sm:$0xff]  ;;  %v190_v16 = vld [vmem:[#allocation8 + $0x18] sm:$0xff]  ;;  %v426_v20 = vpack.c.bf16 %v94_v10, %v93_v9  ;;  %p597_p12 = scmp.ne.s32.totalorder %s293_s3, %s596_s21  ;;  %p602_p0 = scmp.lt.s32.totalorder %s596_s21, %s596_s21 }
  0x5f   :  { %417 = vmatpush3.bf16.msra.mxu0 %v414_v3  ;;  %376 = vmatprep.mubr.f32.mxu0 %v85_v11  ;;  %v188_v13 = vld [vmem:[#allocation8 + $0x8] sm:$0xff]  ;;  %v189_v14 = vld [vmem:[#allocation8 + $0x10] sm:$0xff]  ;;  %v191_v18 = vld [vmem:[#allocation8 + $0x20] sm:$0xff] }
  0x60   :  { %419 = vmatprep.subr.bf16.mxu0 %v418_v5  ;;  %v446_v15 = vpack.c.bf16 %v188_v13, %v187_v12  ;;  %v450_v17 = vpack.c.bf16 %v190_v16, %v189_v14  ;;  %v192_v19 = vld [vmem:[#allocation8 + $0x28] sm:$0xff]  ;;  %v95_v21 = vld [vmem:[#allocation5 + $0x40] sm:$0xff]  ;;  %v193_v24 = vld [vmem:[#allocation8 + $0x30] sm:$0xff]  ;;  %p603_p1 = por %p602_p0, %p601_p13 }
  0x61   :  { %v96_v22 = vld [vmem:[#allocation5 + $0x48] sm:$0xff]  ;;  %v454_v23 = vpack.c.bf16 %v192_v19, %v191_v18  ;;  %v194_v25 = vld [vmem:[#allocation8 + $0x38] sm:$0xff]  ;;  %v97_v27 = vld [vmem:[#allocation5 + $0x50] sm:$0xff] }
  0x62   :  { %447 = vmatprep.subr.bf16.mxu1 %v446_v15  ;;  %v430_v26 = vpack.c.bf16 %v96_v22, %v95_v21  ;;  %v98_v28 = vld [vmem:[#allocation5 + $0x58] sm:$0xff]  ;;  %v458_v29 = vpack.c.bf16 %v194_v25, %v193_v24  ;;  %v195_v30 = vld [vmem:[#allocation8 + $0x40] sm:$0xff]  ;;  %v196_v31 = vld [vmem:[#allocation8 + $0x48] sm:$0xff]  ;;  %p604_p2 = pnand %p603_p1, %p597_p12 }
  0x63   :  { %421 = vmatpush3.bf16.msra.mxu0 %v418_v5  ;;  %449 = vmatpush3.bf16.msra.mxu1 %v446_v15  ;;  %v434_v32 = vpack.c.bf16 %v98_v28, %v97_v27  ;;  %v99_v33 = vld [vmem:[#allocation5 + $0x60] sm:$0xff]  ;;  %v100_v34 = vld [vmem:[#allocation5 + $0x68] sm:$0xff]  ;;  %v462_v35 = vpack.c.bf16 %v196_v31, %v195_v30  ;;  %v197_v36 = vld [vmem:[#allocation8 + $0x50] sm:$0xff] }
  0x64   :  { %423 = vmatprep.subr.bf16.mxu0 %v422_v8  ;;  %451 = vmatprep.subr.bf16.mxu1 %v450_v17  ;;  %v198_v37 = vld [vmem:[#allocation8 + $0x58] sm:$0xff]  ;;  %v438_v38 = vpack.c.bf16 %v100_v34, %v99_v33  ;;  %v101_v39 = vld [vmem:[#allocation5 + $0x70] sm:$0xff]  ;;  %v199_v42 = vld [vmem:[#allocation8 + $0x60] sm:$0xff] }
  0x65   :  { %v102_v40 = vld [vmem:[#allocation5 + $0x78] sm:$0xff]  ;;  %v466_v41 = vpack.c.bf16 %v198_v37, %v197_v36  ;;  %v200_v43 = vld [vmem:[#allocation8 + $0x68] sm:$0xff]  ;;  %v306_v50 = vld [vmem:[#allocation7] ss:$0 sm:$0xff] }
  0x66   :  { %v442_v44 = vpack.c.bf16 %v102_v40, %v101_v39  ;;  %v470_v45 = vpack.c.bf16 %v200_v43, %v199_v42  ;;  %v86_v46 = vld [vmem:[#allocation2 + $0x8] sm:$0xff]  ;;  %v307_v57 = vld [vmem:[#allocation10] ss:$0 sm:$0xff] }
  0x67   :  { %425 = vmatpush3.bf16.msra.mxu0 %v422_v8  ;;  %453 = vmatpush3.bf16.msra.mxu1 %v450_v17  ;;  %v201_v47 = vld [vmem:[#allocation8 + $0x70] sm:$0xff]  ;;  %v202_v48 = vld [vmem:[#allocation8 + $0x78] sm:$0xff] }
  0x68   :  { %427 = vmatprep.subr.bf16.mxu0 %v426_v20  ;;  %455 = vmatprep.subr.bf16.mxu1 %v454_v23  ;;  %v474_v49 = vpack.c.bf16 %v202_v48, %v201_v47 }
  0x6b   :  { %429 = vmatpush3.bf16.msra.mxu0 %v426_v20  ;;  %457 = vmatpush3.bf16.msra.mxu1 %v454_v23 }
  0x6c   :  { %431 = vmatprep.subr.bf16.mxu0 %v430_v26  ;;  %459 = vmatprep.subr.bf16.mxu1 %v458_v29 }
  0x6f   :  { %433 = vmatpush3.bf16.msra.mxu0 %v430_v26  ;;  %461 = vmatpush3.bf16.msra.mxu1 %v458_v29 }
  0x70   :  { %435 = vmatprep.subr.bf16.mxu0 %v434_v32  ;;  %463 = vmatprep.subr.bf16.mxu1 %v462_v35 }
  0x73   :  { %437 = vmatpush3.bf16.msra.mxu0 %v434_v32  ;;  %465 = vmatpush3.bf16.msra.mxu1 %v462_v35 }
  0x74   :  { %439 = vmatprep.subr.bf16.mxu0 %v438_v38  ;;  %467 = vmatprep.subr.bf16.mxu1 %v466_v41 }
  0x77   :  { %441 = vmatpush3.bf16.msra.mxu0 %v438_v38  ;;  %469 = vmatpush3.bf16.msra.mxu1 %v466_v41 }
  0x78   :  { %443 = vmatprep.subr.bf16.mxu0 %v442_v44  ;;  %471 = vmatprep.subr.bf16.mxu1 %v470_v45 }
  0x7b   :  { %445 = vmatpush3.bf16.msra.mxu0 %v442_v44  ;;  %473 = vmatpush3.bf16.msra.mxu1 %v470_v45 }
  0x7c   :  { %475 = vmatprep.subr.bf16.mxu1 %v474_v49 }
  0x7e   :  { %377 = vmatmul.mubr.f32.vlgmr.msra.gmra.mrb[0].mxu0 %v86_v46 }
  0x7f   :  { %477 = vmatpush3.bf16.msra.mxu1 %v474_v49 }
 0x151   :  { %v378_v51 = vpop.f32.mrb[0].mxu0 }
 0x152   :  { %v182_v52 = vadd.f32 %v378_v51, %v306_v50  ;;  %v176_v53 = vpop.f32.mrb[1].mxu0 }
 0x153   :  { %v177_v54 = vadd.f32 %v306_v50, %v176_v53 }
 0x154   :  { %v186_v56 = vmax.f32 %v182_v52, 0.0 }
 0x155   :  { %v185_v55 = vmax.f32 %v177_v54, 0.0 }
 0x157   :  { %411 = vmatprep.mubr.f32.mxu1 %v185_v55 }
 0x158   :  { %412 = vmatmul.mubr.f32.vlgmr.msra.gmra.mrb[0].mxu1 %v186_v56 }
 0x22b   :  { %v413_v58 = vpop.f32.mrb[0].mxu1 }
 0x22c   :  { %v282_v59 = vadd.f32 %v413_v58, %v307_v57  ;;  %v276_v60 = vpop.f32.mrb[1].mxu1 }
 0x22d   :  { %v277_v61 = vadd.f32 %v307_v57, %v276_v60 }
 0x22e   :  { %286 = vst [vmem:[#allocation11 + $0x8] sm:$0xff] %v282_v59 }
 0x22f   :  { %285 = vst [vmem:[#allocation11] sm:$0xff] %v277_v61 }
 0x230   :  { %607 = shalt.err (!%p604_p2)
}
 0x231   :  { %s608_s9 = scalar_lea.hbm %s760_s5, 256 }
 0x232   :  { %p609_p3 = scmp.ne.s32.totalorder %s760_s5, %s608_s9  ;;  %p612_p4 = scmp.lt.u32.totalorder %s608_s9, %s760_s5 }
 0x234   :  { %p614_p5 = pnand %p612_p4, %p609_p3 }
 0x236   :  { %617 = shalt.err (!%p614_p5)
}
 0x237   :  { %298 = dma.vmem_to_hbm [thread:$0]  %s293_s3, 256, %s760_s5, [#allocation4], %s628_s30, %s628_s30, %s629_s6  }
 0x238   :  { %624 = dma.done.wait [#allocation4], 256  }
 0x239   :  { %625 = vsyncadd [#allocation4], 4294967040 }
 0x23a   :  { %302 = vsyncpa [#allocation3], 1 }
 0x23b   :  { %303 = vsyncpa [#allocation6], 1 }
 0x23c   :  { %304 = vsyncpa [#allocation9], 1 }
 0x23d   :  { %305 = vsyncpa [#allocation4], 1 }

</bundles_post_ra>
